<compile_context>
chip_gen: v7x
topology: tpu7x:2x2x1
jax: 0.10.0
libtpu: 0.0.40
codegen_flags: <defaults>
</compile_context>

<pallas_src>
import jax
import jax.numpy as jnp
from jax.experimental import pallas as pl
from jax.experimental.pallas import tpu as pltpu


def _round_up(x, m):
    return ((x + m - 1) // m) * m


def _round_down(x, m):
    return (x // m) * m


def _mlp_kernel(item_ref, w1_ref, ubias_ref, w2_ref, b2_ref, out_ref, acc_ref):
    # item_ref : (TB, TK)    streamed item-embedding tile (f32 or bf16)
    # w1_ref   : (TK, Hp)    streamed item half of fc1 weight (pre-transposed)
    # ubias_ref: (1, Hp)     resident: user_emb @ W1_user.T + b1     (f32)
    # w2_ref   : (8, Hp)     resident fc2 weight (row 0 real, rows 1..7 zero)
    # b2_ref   : (1, 1)      fc2 bias scalar (SMEM)
    # out_ref  : (1, 1, TB)  lane-dense sigmoid scores               (f32)
    # acc_ref  : (TB, Hp)    f32 fc1 accumulator (scratch)
    k = pl.program_id(1)

    @pl.when(k == 0)
    def _():
        acc_ref[...] = jnp.zeros_like(acc_ref)

    f32_inputs = item_ref.dtype == jnp.float32
    prec = jax.lax.Precision.HIGHEST if f32_inputs else jax.lax.Precision.DEFAULT
    acc_ref[...] += jnp.dot(item_ref[...], w1_ref[...],
                            preferred_element_type=jnp.float32,
                            precision=prec)

    @pl.when(k == pl.num_programs(1) - 1)
    def _():
        h = jnp.maximum(acc_ref[...] + ubias_ref[...], 0.0)        # relu, f32 epilogue
        # fc2 (N == 1): (8, Hp) x (TB, Hp)^T on the MXU -> lane-dense row output.
        y8 = jax.lax.dot_general(
            w2_ref[...], h,
            dimension_numbers=(((1,), (1,)), ((), ())),
            preferred_element_type=jnp.float32,
            precision=jax.lax.Precision.HIGHEST)                   # (8, TB)
        y = y8[0:1, :] + b2_ref[0, 0]                              # (1, TB)
        out_ref[...] = jax.nn.sigmoid(y).reshape(out_ref.shape)


def init_params(key, hidden_dim, num_items):
    """Raw torch-layout parameters (same as the nn.Module)."""
    k0, k1, k2, k3, k4, k5 = jax.random.split(key, 6)
    return {
        "user_embedding": jax.random.normal(k0, (1, hidden_dim), jnp.float32),
        "item_embedding": jax.random.normal(k1, (num_items, hidden_dim), jnp.float32),
        "fc1_w": jax.random.normal(k2, (hidden_dim, hidden_dim * 2), jnp.float32) * 0.1,
        "fc1_b": jax.random.normal(k3, (hidden_dim,), jnp.float32) * 0.1,
        "fc2_w": jax.random.normal(k4, (1, hidden_dim), jnp.float32) * 0.1,
        "fc2_b": jax.random.normal(k5, (1,), jnp.float32) * 0.1,
    }


def prepare_params(params, compute_dtype=jnp.bfloat16):
    """One-time reshaping:
      * split/transpose fc1 and fold the constant user-row term + b1 into a bias,
      * zero-pad the hidden dim up to a multiple of 128 (lane-dense, exact),
      * cast the streamed operands (item table, fc1 item weight) to compute_dtype.
    """
    H = params["user_embedding"].shape[1]
    Hp = max(128, _round_up(H, 128))

    w1 = params["fc1_w"]                                   # (H, 2H) torch layout
    w1_user_t = w1[:, :H].T                                # (H, H)
    w1_item_t = w1[:, H:].T                                # (H, H)
    user_bias = (jnp.dot(params["user_embedding"], w1_user_t,
                         precision=jax.lax.Precision.HIGHEST)
                 + params["fc1_b"].reshape(1, -1))         # (1, H)

    def pad2(a, rows, cols):
        return jnp.pad(a, ((0, rows - a.shape[0]), (0, cols - a.shape[1])))

    num_items = params["item_embedding"].shape[0]
    return {
        # TODO(synk): optionally store the table in int8/fp8 with per-row scales
        # folded into the epilogue for further HBM-bandwidth savings.
        "item_embedding": pad2(params["item_embedding"], num_items, Hp
                               ).astype(compute_dtype),    # (num_items, Hp)
        "fc1_w_item_t": pad2(w1_item_t, Hp, Hp).astype(compute_dtype),  # (Hp, Hp)
        "user_bias": pad2(user_bias, 1, Hp).astype(jnp.float32),        # (1, Hp)
        "fc2_w": pad2(params["fc2_w"], 8, Hp).astype(jnp.float32),      # (8, Hp)
        "fc2_b": params["fc2_b"].astype(jnp.float32),                   # (1,)
    }


def _vmem_plan():
    """(budget, vmem_limit) per TPU generation (v5e/v6e: 128 MiB, v7x: 64 MiB)."""
    mib = 1024 * 1024
    try:
        info = pltpu.get_tpu_info()
        phys = int(getattr(info, "vmem_capacity_bytes", 64 * mib))
    except Exception:
        phys = 64 * mib                                    # conservative (v7x-class)
    if phys <= 64 * mib:
        return 24 * mib, 32 * mib                          # v7x
    return 64 * mib, 100 * mib                             # v5e / v6e


def base_model_forward(item_id, prepared, *, block_rows=1024):
    """item_id: int [B]; returns float32 [B] (sigmoid scores)."""
    item_table = prepared["item_embedding"]                # (num_items, Hp)
    w1_item_t = prepared["fc1_w_item_t"]                   # (Hp, Hp)
    user_bias = prepared["user_bias"]                      # (1, Hp)
    w2_rows = prepared["fc2_w"]                            # (8, Hp)
    b2 = prepared["fc2_b"].reshape(1, 1)                   # (1, 1) SMEM scalar

    Hp = w1_item_t.shape[0]
    B = int(item_id.shape[0])
    mm_dtype = item_table.dtype
    bytes_per = jnp.dtype(mm_dtype).itemsize
    row_align = 16 if bytes_per == 2 else 8

    vmem_budget, vmem_limit = _vmem_plan()

    # --- K tiling: keep the *double-buffered* streamed weight tile under budget.
    weight_budget = vmem_budget // 2
    n128 = Hp // 128
    tk = 128
    for d in range(1, n128 + 1):
        if n128 % d:
            continue
        cand = Hp // d
        if 2 * cand * Hp * bytes_per <= weight_budget:
            tk = cand
            break
    nk = Hp // tk

    # --- batch tiling: double-buffered item tiles + f32 accumulator + consts.
    const_bytes = 2 * (1 + 8) * Hp * 4                     # ubias + fc2 rows, x2 buffers
    remaining = vmem_budget - 2 * tk * Hp * bytes_per - const_bytes
    per_row = 2 * tk * bytes_per + Hp * 4 + 2 * 4          # 2x item + acc + out row
    if remaining <= per_row * row_align:
        raise ValueError(
            f"hidden_dim too large for the VMEM budget even with K-tiling "
            f"(Hp={Hp}, tk={tk}, budget={vmem_budget})")
    max_rows = max(row_align, _round_down(remaining // per_row, row_align))

    b_req = _round_up(B, row_align)
    tb = min(block_rows, max_rows, b_req)
    if b_req >= 128 and tb >= 128:
        tb = _round_down(tb, 128)                          # full MXU M occupancy
    else:
        tb = max(row_align, _round_down(tb, row_align))
    # Prefer >= 2 batch tiles when B permits so the "parallel" batch axis can be
    # sharded across both v7x TensorCores (harmless on 1-TC chips).
    if tb >= b_req and b_req >= 2 * row_align:
        tb = _round_up(b_req // 2, row_align)

    b_pad = _round_up(B, tb)
    nb = b_pad // tb

    # Pad the cheap id vector, NOT the gathered (B, Hp) matrix.
    ids = item_id.astype(jnp.int32)
    if b_pad != B:
        ids = jnp.pad(ids, (0, b_pad - B))
    # Embedding gather stays a single XLA gather.
    # TODO(synk): fuse the gather in-kernel (scalar-prefetch ids + per-tile row
    # DMA or a resident table) to remove the extra HBM round trip of item_emb.
    item_emb = item_table[ids]                             # (b_pad, Hp), mm_dtype

    out = pl.pallas_call(
        _mlp_kernel,
        out_shape=jax.ShapeDtypeStruct((nb, 1, tb), jnp.float32),
        grid=(nb, nk),
        in_specs=[
            pl.BlockSpec((tb, tk), lambda i, k: (i, k)),          # streamed item tile
            pl.BlockSpec((tk, Hp), lambda i, k: (k, 0)),          # streamed fc1 weight
            pl.BlockSpec((1, Hp), lambda i, k: (0, 0)),           # resident user bias
            pl.BlockSpec((8, Hp), lambda i, k: (0, 0)),           # resident fc2 rows
            pl.BlockSpec(memory_space=pltpu.MemorySpace.SMEM),    # fc2 bias scalar
        ],
        out_specs=pl.BlockSpec((1, 1, tb), lambda i, k: (i, 0, 0)),  # lane-dense row
        scratch_shapes=[pltpu.VMEM((tb, Hp), jnp.float32)],
        compiler_params=pltpu.CompilerParams(
            dimension_semantics=("parallel", "arbitrary"),
            vmem_limit_bytes=vmem_limit,
        ),
    )(item_emb, w1_item_t, user_bias, w2_rows, b2)

    return out.reshape(b_pad)[:B]                          # squeeze(-1) + unpad


def _reference_forward(item_id, params):
    """Faithful translation of the torch forward (concat + full fc1)."""
    B = item_id.shape[0]
    user = jnp.broadcast_to(params["user_embedding"],
                            (B, params["user_embedding"].shape[1]))
    item = params["item_embedding"][item_id]
    x = jnp.concatenate([user, item], axis=1)
    h = jax.nn.relu(jnp.dot(x, params["fc1_w"].T,
                            precision=jax.lax.Precision.HIGHEST)
                    + params["fc1_b"])
    y = jnp.dot(h, params["fc2_w"].T,
                precision=jax.lax.Precision.HIGHEST) + params["fc2_b"]
    return jax.nn.sigmoid(y)[:, 0]


if __name__ == "__main__":
    hidden_dim = 32
    num_items = 50
    batch = 8

    key = jax.random.PRNGKey(0)
    pkey, ikey = jax.random.split(key)
    params = init_params(pkey, hidden_dim, num_items)
    item_id = jax.random.randint(ikey, (batch,), 0, num_items, dtype=jnp.int32)

    ref = jax.block_until_ready(_reference_forward(item_id, params))

    # f32-operand path: validates the fold / padding / layout restructuring.
    out_f32 = jax.block_until_ready(
        base_model_forward(item_id, prepare_params(params, jnp.float32)))
    assert out_f32.shape == (batch,)
    assert jnp.allclose(out_f32, ref, atol=2e-3, rtol=2e-3), (out_f32, ref)

    # Default path: bf16 operands, f32 accumulation + f32 epilogue.
    out_bf16 = jax.block_until_ready(
        base_model_forward(item_id, prepare_params(params)))
    assert out_bf16.shape == (batch,)
    assert jnp.allclose(out_bf16, ref, atol=2e-2, rtol=2e-2), (out_bf16, ref)

    print("KERNEL_OK")
</pallas_src>

<mosaic_0001>
module attributes {stable_mosaic.version = 11 : i64} {
  func.func @_mlp_kernel(%arg0: i32, %arg1: i32, %arg2: memref<8x128xf32, #tpu.memory_space<vmem>>, %arg3: memref<128x128xf32, #tpu.memory_space<vmem>>, %arg4: memref<1x128xf32, #tpu.memory_space<vmem>>, %arg5: memref<8x128xf32, #tpu.memory_space<vmem>>, %arg6: memref<1x1xf32, #tpu.memory_space<smem>>, %arg7: memref<1x1x8xf32, #tpu.memory_space<vmem>>, %arg8: memref<8x128xf32, #tpu.memory_space<vmem>>) attributes {dimension_semantics = [#tpu.dimension_semantics<parallel>, #tpu.dimension_semantics<arbitrary>], iteration_bounds = array<i64: 1, 1>, scalar_prefetch = 0 : i64, scratch_operands = 1 : i64, tpu.core_type = #tpu.core_type<tc>, window_params = [{transform_indices = @transform_0, window_bounds = array<i64: 8, 128>}, {transform_indices = @transform_1, window_bounds = array<i64: 128, 128>}, {pipeline_mode = #tpu.pipeline_mode<synchronous>, transform_indices = @transform_2, window_bounds = array<i64: 1, 128>}, {pipeline_mode = #tpu.pipeline_mode<synchronous>, transform_indices = @transform_3, window_bounds = array<i64: 8, 128>}, {transform_indices = @transform_4, window_bounds = array<i64: 1, 1>}, {transform_indices = @transform_5, window_bounds = array<i64: 1, 1, 8>}]} {
    %c0_i32 = arith.constant 0 : i32
    %0 = arith.cmpi eq, %arg1, %c0_i32 : i32
    %1 = arith.extui %0 : i1 to i32
    %c0_i32_0 = arith.constant 0 : i32
    %2 = arith.cmpi ne, %1, %c0_i32_0 : i32
    scf.if %2 {
      %cst_10 = arith.constant 0.000000e+00 : f32
      %12 = vector.broadcast %cst_10 : f32 to vector<8x128xf32>
      %c0_11 = arith.constant 0 : index
      %c0_12 = arith.constant 0 : index
      %13 = vector.load %arg8[%c0_11, %c0_12] : memref<8x128xf32, #tpu.memory_space<vmem>>, vector<8x128xf32>
      tpu.vector_store %arg8[%c0_11, %c0_12], %12 {strides = array<i32>} : memref<8x128xf32, #tpu.memory_space<vmem>>, vector<8x128xf32>,
    } else {
    }
    %c0 = arith.constant 0 : index
    %c0_1 = arith.constant 0 : index
    %3 = vector.load %arg8[%c0, %c0_1] : memref<8x128xf32, #tpu.memory_space<vmem>>, vector<8x128xf32>
    %c0_2 = arith.constant 0 : index
    %c0_3 = arith.constant 0 : index
    %4 = vector.load %arg2[%c0_2, %c0_3] : memref<8x128xf32, #tpu.memory_space<vmem>>, vector<8x128xf32>
    %c0_4 = arith.constant 0 : index
    %c0_5 = arith.constant 0 : index
    %5 = vector.load %arg3[%c0_4, %c0_5] : memref<128x128xf32, #tpu.memory_space<vmem>>, vector<128x128xf32>
    %cst = arith.constant dense<0.000000e+00> : vector<8x128xf32>
    %6 = tpu.matmul %4, %5, %cst {dimension_numbers = #tpu.dot_dimension_numbers<[1], [0], [0], [1], [0, 0, 1, 1], [], []>, precision = #tpu.contract_precision<fp32>} : vector<8x128xf32>, vector<128x128xf32>, vector<8x128xf32> -> vector<8x128xf32>
    %7 = arith.addf %3, %6 : vector<8x128xf32>
    %c0_6 = arith.constant 0 : index
    %c0_7 = arith.constant 0 : index
    %8 = vector.load %arg8[%c0_6, %c0_7] : memref<8x128xf32, #tpu.memory_space<vmem>>, vector<8x128xf32>
    tpu.vector_store %arg8[%c0_6, %c0_7], %7 {strides = array<i32>} : memref<8x128xf32, #tpu.memory_space<vmem>>, vector<8x128xf32>,
    %c0_i32_8 = arith.constant 0 : i32
    %9 = arith.cmpi eq, %arg1, %c0_i32_8 : i32
    %10 = arith.extui %9 : i1 to i32
    %c0_i32_9 = arith.constant 0 : i32
    %11 = arith.cmpi ne, %10, %c0_i32_9 : i32
    scf.if %11 {
      %c0_10 = arith.constant 0 : index
      %c0_11 = arith.constant 0 : index
      %12 = vector.load %arg8[%c0_10, %c0_11] : memref<8x128xf32, #tpu.memory_space<vmem>>, vector<8x128xf32>
      %c0_12 = arith.constant 0 : index
      %c0_13 = arith.constant 0 : index
      %13 = vector.load %arg4[%c0_12, %c0_13] : memref<1x128xf32, #tpu.memory_space<vmem>>, vector<1x128xf32>
      %14 = vector.broadcast %13 : vector<1x128xf32> to vector<8x128xf32>
      %15 = arith.addf %12, %14 : vector<8x128xf32>
      %cst_14 = arith.constant 0.000000e+00 : f32
      %16 = vector.broadcast %cst_14 : f32 to vector<8x128xf32>
      %17 = arith.maximumf %15, %16 : vector<8x128xf32>
      %c0_15 = arith.constant 0 : index
      %c0_16 = arith.constant 0 : index
      %18 = vector.load %arg5[%c0_15, %c0_16] : memref<8x128xf32, #tpu.memory_space<vmem>>, vector<8x128xf32>
      %cst_17 = arith.constant dense<0.000000e+00> : vector<8x8xf32>
      %19 = tpu.matmul %18, %17, %cst_17 {dimension_numbers = #tpu.dot_dimension_numbers<[1], [1], [0], [0], [0, 0, 1, 0], [], []>, precision = #tpu.contract_precision<fp32>} : vector<8x128xf32>, vector<8x128xf32>, vector<8x8xf32> -> vector<8x8xf32>
      %20 = vector.extract_strided_slice %19 {offsets = [0, 0], sizes = [1, 8], strides = [1, 1]} : vector<8x8xf32> to vector<1x8xf32>
      %c0_18 = arith.constant 0 : index
      %c0_19 = arith.constant 0 : index
      %21 = memref.load %arg6[%c0_18, %c0_19] : memref<1x1xf32, #tpu.memory_space<smem>>
      %22 = vector.broadcast %21 : f32 to vector<1x8xf32>
      %23 = arith.addf %20, %22 : vector<1x8xf32>
      %24 = arith.negf %23 : vector<1x8xf32>
      %25 = math.exp %24 : vector<1x8xf32>
      %cst_20 = arith.constant 1.000000e+00 : f32
      %26 = vector.broadcast %cst_20 : f32 to vector<1x8xf32>
      %27 = arith.addf %26, %25 : vector<1x8xf32>
      %28 = arith.divf %26, %27 : vector<1x8xf32>
      %29 = vector.shape_cast %28 : vector<1x8xf32> to vector<1x1x8xf32>
      %c0_21 = arith.constant 0 : index
      %c0_22 = arith.constant 0 : index
      %c0_23 = arith.constant 0 : index
      %30 = vector.load %arg7[%c0_21, %c0_22, %c0_23] : memref<1x1x8xf32, #tpu.memory_space<vmem>>, vector<1x1x8xf32>
      tpu.vector_store %arg7[%c0_21, %c0_22, %c0_23], %29 {strides = array<i32>} : memref<1x1x8xf32, #tpu.memory_space<vmem>>, vector<1x1x8xf32>,
    } else {
    }
    return
  }
  func.func @transform_0(%arg0: i32, %arg1: i32) -> (i32, i32) {
    %c0_i32 = arith.constant 0 : i32
    return %arg0, %arg1 : i32, i32
  }
  func.func @transform_1(%arg0: i32, %arg1: i32) -> (i32, i32) {
    %c0_i32 = arith.constant 0 : i32
    %c0_i32_0 = arith.constant 0 : i32
    return %arg1, %c0_i32 : i32, i32
  }
  func.func @transform_2(%arg0: i32, %arg1: i32) -> (i32, i32) {
    %c0_i32 = arith.constant 0 : i32
    %c0_i32_0 = arith.constant 0 : i32
    %c0_i32_1 = arith.constant 0 : i32
    return %c0_i32, %c0_i32_0 : i32, i32
  }
  func.func @transform_3(%arg0: i32, %arg1: i32) -> (i32, i32) {
    %c0_i32 = arith.constant 0 : i32
    %c0_i32_0 = arith.constant 0 : i32
    %c0_i32_1 = arith.constant 0 : i32
    return %c0_i32, %c0_i32_0 : i32, i32
  }
  func.func @transform_4(%arg0: i32, %arg1: i32) -> (i32, i32) {
    %c0_i32 = arith.constant 0 : i32
    %c0_i32_0 = arith.constant 0 : i32
    %c0_i32_1 = arith.constant 0 : i32
    return %c0_i32, %c0_i32_0 : i32, i32
  }
  func.func @transform_5(%arg0: i32, %arg1: i32) -> (i32, i32, i32) {
    %c0_i32 = arith.constant 0 : i32
    %c0_i32_0 = arith.constant 0 : i32
    %c0_i32_1 = arith.constant 0 : i32
    return %arg0, %c0_i32, %c0_i32_0 : i32, i32, i32
  }
}

</mosaic_0001>

<bundles_post_ra>
// kernel: tpu_custom_call.1
= control target key start
LH: loop header
LB: loop body
LE: loop exit
PB: predicated region body
PF: predicated region fallthrough
CT: control target
= control target key end

     0   :  { %11 = vsyncpa [#allocation5], 0  ;;  %s2152_s0 = inlined_call_operand.hbm [shape: f32[8,128], index: 0, kind: input, shape index: {}]   ;;  %s2153_s1 = inlined_call_operand.hbm [shape: f32[128,128], index: 1, kind: input, shape index: {}]   ;;  %s2154_s2 = inlined_call_operand.vmem [shape: f32[1,128], index: 2, kind: input, shape index: {}]   ;;  %s2155_s3 = inlined_call_operand.vmem [shape: f32[8,128], index: 3, kind: input, shape index: {}]   ;;  %s2156_s4 = inlined_call_operand.<no memory space> [shape: f32[1,1], index: 4, kind: input, shape index: {}]   ;;  %s2157_s5 = inlined_call_operand.hbm [shape: f32[1,1,8], index: 5, kind: output, shape index: {}]  }
   0x1   :  { %12 = vsyncpa [#allocation8], 0 }
   0x2   :  { %13 = vsyncpa [#allocation6], 0  ;;  %s1785_s18 = smov [#allocation4]   ;;  %s1786_s20 = smov [#allocation7]  }
   0x3   :  { %s20_s19 = sshll.u32 %s1785_s18, 4  ;;  %s29_s21 = sshll.u32 %s1786_s20, 4  ;;  %s21_s19 = int_to_ptr.vmem [resolvable:$true] %s20_s19  ;;  %s1823_s21 = int_to_ptr.vmem [resolvable:$true] %s29_s21 }
   0x4   :  { %s1713_s24 = scalar_lea.hbm %s2152_s0, 128 }
   0x5   :  { %p1714_p0 = scmp.ne.s32.totalorder %s2152_s0, %s1713_s24  ;;  %p1717_p1 = scmp.lt.u32.totalorder %s1713_s24, %s2152_s0 }
   0x7   :  { %p1719_p2 = pnand %p1717_p1, %p1714_p0 }
   0x9   :  { %1722 = shalt.err (!%p1719_p2)
}
   0xa   :  { %s1723_s29 = scalar_lea.vmem %s21_s19, 128  ;;  %p1728_p4 = scmp.lt.s32.totalorder %s21_s19, %s21_s19 }
   0xb   :  { %p1724_p3 = scmp.ne.s32.totalorder %s21_s19, %s1723_s29  ;;  %p1729_p5 = scmp.lt.s32.totalorder %s1723_s29, %s1723_s29 }
   0xd   :  { %p1730_p6 = por %p1729_p5, %p1728_p4 }
   0xf   :  { %p1731_p7 = pnand %p1730_p6, %p1724_p3 }
  0x11   :  { %1734 = shalt.err (!%p1731_p7)
}
  0x12   :  { %23 = dma.hbm_to_vmem [thread:$0]  %s2152_s0, 128, %s21_s19, [#allocation5]  }
  0x13   :  { %s1735_s9 = scalar_lea.hbm %s2153_s1, 2048 }
  0x14   :  { %p1736_p8 = scmp.ne.s32.totalorder %s2153_s1, %s1735_s9  ;;  %p1739_p9 = scmp.lt.u32.totalorder %s1735_s9, %s2153_s1 }
  0x16   :  { %p1741_p10 = pnand %p1739_p9, %p1736_p8 }
  0x18   :  { %1744 = shalt.err (!%p1741_p10)
}
  0x19   :  { %s1745_s14 = scalar_lea.vmem %s1823_s21, 2048  ;;  %p1750_p12 = scmp.lt.s32.totalorder %s1823_s21, %s1823_s21 }
  0x1a   :  { %p1746_p11 = scmp.ne.s32.totalorder %s1823_s21, %s1745_s14  ;;  %p1751_p13 = scmp.lt.s32.totalorder %s1745_s14, %s1745_s14 }
  0x1c   :  { %p1752_p0 = por %p1751_p13, %p1750_p12 }
  0x1e   :  { %p1753_p1 = pnand %p1752_p0, %p1746_p11 }
  0x20   :  { %1756 = shalt.err (!%p1753_p1)
}
  0x21   :  { %s1787_s0 = smov 128   ;;  %s1788_s15 = smov 8  }
  0x22   :  { %35 = dma.hbm_to_vmem [thread:$0]  %s2153_s1, 2048, %s1823_s21, [#allocation8], %s1787_s0, %s1787_s0, %s1788_s15  }
  0x23   :  { %1779 = dma.done.wait [#allocation5], 128  }
  0x24   :  { %1780 = vsyncadd [#allocation5], 4294967168 }
  0x25   :  { %1781 = dma.done.wait [#allocation8], 2048  }
  0x26   :  { %1782 = vsyncadd [#allocation8], 4294965248  ;;  %v1789_v0 = vmov 0.0|0.0   ;;  %vm1790_vm0 = vmmov 0   ;;  %v1791_v1 = vmov 0.0   ;;  %v55_v2 = vld [vmem:[#allocation7] sm:$0xff] }
  0x27   :  { %1557 = vmatprep.subr.bf16.mxu0 %v1789_v0  ;;  %1581 = vmatprep.subr.bf16.mxu1 %v1789_v0  ;;  %v56_v3 = vld [vmem:[#allocation7 + $0x8] sm:$0xff]  ;;  %v57_v4 = vld [vmem:[#allocation7 + $0x10] sm:$0xff]  ;;  %v72_v5 = vand.u32 4294901760, %v55_v2  ;;  %v58_v7 = vld [vmem:[#allocation7 + $0x18] sm:$0xff]  ;;  %s1792_s21 = smov [#allocation9]   ;;  %vm1183_vm1 = vcmask 57344  }
  0x28   :  { %1349 = vmatprep.mubr.msk.f32.mxu0 %vm1790_vm0, %v1791_v1  ;;  %1384 = vmatprep.mubr.msk.f32.mxu1 %vm1790_vm0, %v1791_v1  ;;  %v75_v6 = vand.u32 4294901760, %v56_v3  ;;  %v78_v8 = vand.u32 4294901760, %v57_v4  ;;  %v59_v9 = vld [vmem:[#allocation7 + $0x20] sm:$0xff]  ;;  %v60_v10 = vld [vmem:[#allocation7 + $0x28] sm:$0xff]  ;;  %v81_v11 = vand.u32 4294901760, %v58_v7  ;;  %v61_v14 = vld [vmem:[#allocation7 + $0x30] sm:$0xff] }
  0x29   :  { %v84_v12 = vand.u32 4294901760, %v59_v9  ;;  %v87_v13 = vand.u32 4294901760, %v60_v10  ;;  %v1862_v16 = vsub.f32 %v55_v2, %v72_v5  ;;  %v62_v19 = vld [vmem:[#allocation7 + $0x38] sm:$0xff]  ;;  %v63_v20 = vld [vmem:[#allocation7 + $0x40] sm:$0xff]  ;;  %v90_v26 = vand.u32 4294901760, %v61_v14  ;;  %v64_v27 = vld [vmem:[#allocation7 + $0x48] sm:$0xff] }
  0x2a   :  { %v1860_v15 = vpack.c.bf16 %v75_v6, %v72_v5  ;;  %v1864_v17 = vsub.f32 %v56_v3, %v75_v6  ;;  %v1866_v18 = vsub.f32 %v57_v4, %v78_v8  ;;  %v1868_v21 = vpack.c.bf16 %v81_v11, %v78_v8  ;;  %v65_v40 = vld [vmem:[#allocation7 + $0x50] sm:$0xff]  ;;  %v66_v41 = vld [vmem:[#allocation7 + $0x58] sm:$0xff]  ;;  %v67_v50 = vld [vmem:[#allocation7 + $0x60] sm:$0xff]  ;;  %s1191_s22 = sshll.u32 %s1792_s21, 4  ;;  %s1192_s22 = int_to_ptr.vmem [resolvable:$true] %s1191_s22 }
  0x2b   :  { %v1870_v22 = vsub.f32 %v58_v7, %v81_v11  ;;  %v1873_v23 = vsub.f32 %v59_v9, %v84_v12  ;;  %v165_v24 = vand.u32 4294901760, %v1862_v16  ;;  %v93_v28 = vand.u32 4294901760, %v62_v19  ;;  %v68_v59 = vld [vmem:[#allocation7 + $0x68] sm:$0xff]  ;;  %v69_v2 = vld [vmem:[#allocation7 + $0x70] sm:$0xff]  ;;  %v70_v7 = vld [vmem:[#allocation7 + $0x78] sm:$0xff]  ;;  %s1757_s23 = scalar_lea.vmem %s1192_s22, 16  ;;  %p1762_p3 = scmp.lt.s32.totalorder %s1192_s22, %s1192_s22 }
  0x2c   :  { %1559 = vmatpush3.bf16.msra.mxu0 %v1860_v15  ;;  %v172_v25 = vand.u32 4294901760, %v1864_v17  ;;  %v179_v29 = vand.u32 4294901760, %v1866_v18  ;;  %v96_v31 = vand.u32 4294901760, %v63_v20  ;;  %v1880_v32 = vsub.f32 %v60_v10, %v87_v13  ;;  %p1758_p2 = scmp.ne.s32.totalorder %s1192_s22, %s1757_s23  ;;  %s1761_s24 = scalar_lea.vmem %s1192_s22, 32 }
  0x2d   :  { %1560 = vmatprep.subr.bf16.mxu0 %v1789_v0  ;;  %v186_v30 = vand.u32 4294901760, %v1870_v22  ;;  %v166_v33 = vsub.f32 %v1862_v16, %v165_v24  ;;  %v1888_v35 = vsub.f32 %v61_v14, %v90_v26  ;;  %v1890_v36 = vsub.f32 %v62_v19, %v93_v28  ;;  %p1763_p4 = scmp.lt.s32.totalorder %s1761_s24, %s1757_s23 }
  0x2e   :  { %v173_v34 = vsub.f32 %v1864_v17, %v172_v25  ;;  %v180_v37 = vsub.f32 %v1866_v18, %v179_v29  ;;  %v99_v39 = vand.u32 4294901760, %v64_v27  ;;  %v1899_v42 = vpack.c.bf16 %v87_v13, %v84_v12 }
  0x2f   :  { %v187_v38 = vsub.f32 %v1870_v22, %v186_v30  ;;  %v167_v43 = vand.u32 4294901760, %v166_v33  ;;  %v1901_v45 = vpack.c.bf16 %v93_v28, %v90_v26  ;;  %v1904_v48 = vsub.f32 %v63_v20, %v96_v31  ;;  %p1764_p5 = por %p1763_p4, %p1762_p3 }
  0x30   :  { %1562 = vmatpush3.bf16.msra.mxu0 %v1868_v21  ;;  %v174_v44 = vand.u32 4294901760, %v173_v34  ;;  %v181_v46 = vand.u32 4294901760, %v180_v37  ;;  %v193_v49 = vand.u32 4294901760, %v1873_v23  ;;  %v200_v52 = vand.u32 4294901760, %v1880_v32 }
  0x31   :  { %1563 = vmatprep.subr.bf16.mxu0 %v1789_v0  ;;  %v188_v47 = vand.u32 4294901760, %v187_v38  ;;  %v102_v53 = vand.u32 4294901760, %v65_v40  ;;  %v105_v54 = vand.u32 4294901760, %v66_v41  ;;  %v1908_v55 = vsub.f32 %v64_v27, %v99_v39  ;;  %p1765_p6 = pnand %p1764_p5, %p1758_p2 }
  0x32   :  { %v1582_v51 = vpack.c.bf16 %v174_v44, %v167_v43  ;;  %v194_v56 = vsub.f32 %v1873_v23, %v193_v49  ;;  %v207_v57 = vand.u32 4294901760, %v1888_v35  ;;  %v214_v58 = vand.u32 4294901760, %v1890_v36 }
  0x33   :  { %v1585_v60 = vpack.c.bf16 %v188_v47, %v181_v46  ;;  %v1916_v61 = vpack.c.bf16 %v99_v39, %v96_v31  ;;  %v201_v62 = vsub.f32 %v1880_v32, %v200_v52  ;;  %v108_v63 = vand.u32 4294901760, %v67_v50  ;;  %v54_v31 = vld [vmem:[#allocation4] sm:$0xff] }
  0x34   :  { %1565 = vmatpush3.bf16.msra.mxu0 %v1899_v42  ;;  %1583 = vmatpush3.bf16.msra.mxu1 %v1582_v51  ;;  %v195_v3 = vand.u32 4294901760, %v194_v56  ;;  %v1923_v4 = vsub.f32 %v65_v40, %v102_v53  ;;  %v208_v5 = vsub.f32 %v1888_v35, %v207_v57  ;;  %v215_v6 = vsub.f32 %v1890_v36, %v214_v58 }
  0x35   :  { %1566 = vmatprep.subr.bf16.mxu0 %v1789_v0  ;;  %1584 = vmatprep.subr.bf16.mxu1 %v1789_v0  ;;  %v202_v8 = vand.u32 4294901760, %v201_v62  ;;  %v1931_v9 = vsub.f32 %v66_v41, %v105_v54  ;;  %v111_v10 = vand.u32 4294901760, %v68_v59  ;;  %v221_v11 = vand.u32 4294901760, %v1904_v48 }
  0x36   :  { %v209_v12 = vand.u32 4294901760, %v208_v5  ;;  %v216_v13 = vand.u32 4294901760, %v215_v6  ;;  %v228_v14 = vand.u32 4294901760, %v1908_v55  ;;  %v114_v19 = vand.u32 4294901760, %v69_v2 }
  0x37   :  { %v1588_v20 = vpack.c.bf16 %v202_v8, %v195_v3  ;;  %v1936_v26 = vsub.f32 %v67_v50, %v108_v63  ;;  %v1938_v27 = vsub.f32 %v68_v59, %v111_v10  ;;  %v117_v28 = vand.u32 4294901760, %v70_v7 }
  0x38   :  { %1568 = vmatpush3.bf16.msra.mxu0 %v1901_v45  ;;  %1586 = vmatpush3.bf16.msra.mxu1 %v1585_v60  ;;  %v222_v33 = vsub.f32 %v1904_v48, %v221_v11  ;;  %v229_v34 = vsub.f32 %v1908_v55, %v228_v14  ;;  %v235_v37 = vand.u32 4294901760, %v1923_v4  ;;  %v1949_v38 = vpack.c.bf16 %v105_v54, %v102_v53 }
  0x39   :  { %1569 = vmatprep.subr.bf16.mxu0 %v1789_v0  ;;  %1587 = vmatprep.subr.bf16.mxu1 %v1789_v0  ;;  %v1591_v39 = vpack.c.bf16 %v216_v13, %v209_v12  ;;  %v1951_v40 = vsub.f32 %v69_v2, %v114_v19  ;;  %v242_v41 = vand.u32 4294901760, %v1931_v9  ;;  %v1957_v47 = vand.u32 4294901760, %v54_v31 }
  0x3a   :  { %v223_v43 = vand.u32 4294901760, %v222_v33  ;;  %v230_v44 = vand.u32 4294901760, %v229_v34  ;;  %v236_v46 = vsub.f32 %v1923_v4, %v235_v37  ;;  %v1960_v50 = vsub.f32 %v70_v7, %v117_v28 }
  0x3b   :  { %v243_v51 = vsub.f32 %v1931_v9, %v242_v41  ;;  %v249_v53 = vand.u32 4294901760, %v1936_v26  ;;  %v256_v54 = vand.u32 4294901760, %v1938_v27  ;;  %v1970_v56 = vsub.f32 %v54_v31, %v1957_v47 }
  0x3c   :  { %1571 = vmatpush3.bf16.msra.mxu0 %v1916_v61  ;;  %1589 = vmatpush3.bf16.msra.mxu1 %v1588_v20  ;;  %v1972_v59 = vpack.c.bf16 %v111_v10, %v108_v63  ;;  %v1594_v60 = vpack.c.bf16 %v230_v44, %v223_v43  ;;  %v237_v62 = vand.u32 4294901760, %v236_v46  ;;  %v263_v3 = vand.u32 4294901760, %v1951_v40 }
  0x3d   :  { %1572 = vmatprep.subr.bf16.mxu0 %v1789_v0  ;;  %1590 = vmatprep.subr.bf16.mxu1 %v1789_v0  ;;  %v154_v2 = vand.u32 4294901760, %v1970_v56  ;;  %v244_v5 = vand.u32 4294901760, %v243_v51  ;;  %v250_v6 = vsub.f32 %v1936_v26, %v249_v53  ;;  %v257_v7 = vsub.f32 %v1938_v27, %v256_v54 }
  0x3e   :  { %v270_v63 = vand.u32 4294901760, %v1960_v50  ;;  %v1986_v8 = vpack.c.bf16 %v117_v28, %v114_v19  ;;  %v264_v12 = vsub.f32 %v1951_v40, %v263_v3  ;;  %v1606_v34 = vpack.c.bf16 %v1864_v17, %v1862_v16 }
  0x3f   :  { %v155_v10 = vsub.f32 %v1970_v56, %v154_v2  ;;  %v1597_v13 = vpack.c.bf16 %v244_v5, %v237_v62  ;;  %v251_v20 = vand.u32 4294901760, %v250_v6  ;;  %v258_v31 = vand.u32 4294901760, %v257_v7 }
  0x40   :  { %1574 = vmatpush3.bf16.msra.mxu0 %v1949_v38  ;;  %1592 = vmatpush3.bf16.msra.mxu1 %v1591_v39  ;;  %v271_v33 = vsub.f32 %v1960_v50, %v270_v63  ;;  %v265_v39 = vand.u32 4294901760, %v264_v12  ;;  %v1609_v46 = vpack.c.bf16 %v1870_v22, %v1866_v18  ;;  %v1612_v51 = vpack.c.bf16 %v1880_v32, %v1873_v23 }
  0x41   :  { %1575 = vmatprep.subr.bf16.mxu0 %v1789_v0  ;;  %1593 = vmatprep.subr.bf16.mxu1 %v1789_v0  ;;  %v156_v19 = vand.u32 4294901760, %v155_v10  ;;  %v1600_v28 = vpack.c.bf16 %v258_v31, %v251_v20  ;;  %v1618_v62 = vpack.c.bf16 %v1908_v55, %v1904_v48  ;;  %v1621_v5 = vpack.c.bf16 %v1931_v9, %v1923_v4  ;;  %v727_v48 = vld [vmem:[%s2155_s3] sm:$0xff] }
  0x42   :  { %v272_v43 = vand.u32 4294901760, %v271_v33  ;;  %v1624_v6 = vpack.c.bf16 %v1938_v27, %v1936_v26  ;;  %v1627_v7 = vpack.c.bf16 %v1960_v50, %v1951_v40  ;;  %v1654_v10 = vpack.c.bf16 %v172_v25, %v165_v24  ;;  %v1201_v4 = vld [vmem:[%s2154_s2] ss:$0 sm:$0xff] }
  0x43   :  { %v1657_v12 = vpack.c.bf16 %v186_v30, %v179_v29  ;;  %v1660_v16 = vpack.c.bf16 %v200_v52, %v193_v49  ;;  %v1663_v17 = vpack.c.bf16 %v214_v58, %v207_v57  ;;  %v1669_v18 = vpack.c.bf16 %v242_v41, %v235_v37 }
  0x44   :  { %1577 = vmatpush3.bf16.msra.mxu0 %v1972_v59  ;;  %1595 = vmatpush3.bf16.msra.mxu1 %v1594_v60  ;;  %v1603_v44 = vpack.c.bf16 %v272_v43, %v265_v39  ;;  %v1615_v60 = vpack.c.bf16 %v1890_v36, %v1888_v35  ;;  %v1675_v22 = vpack.c.bf16 %v270_v63, %v263_v3  ;;  %v794_v52 = vand.u32 4294901760, %v727_v48 }
  0x45   :  { %1578 = vmatprep.subr.bf16.mxu0 %v1789_v0  ;;  %1596 = vmatprep.subr.bf16.mxu1 %v1789_v0 }
  0x46   :  { %v795_v58 = vsub.f32 %v727_v48, %v794_v52 }
  0x48   :  { %1580 = vmatpush3.bf16.msra.mxu0 %v1986_v8  ;;  %1598 = vmatpush3.bf16.msra.mxu1 %v1597_v13  ;;  %v796_v9 = vand.u32 4294901760, %v795_v58 }
  0x49   :  { %1599 = vmatprep.subr.bf16.mxu1 %v1789_v0  ;;  %1605 = vmatprep.subr.bf16.mxu0 %v1789_v0 }
  0x4a   :  { %v797_v27 = vsub.f32 %v795_v58, %v796_v9 }
  0x4b   :  { %1350 = vmatmul.mubr.f32.vlgmr.msra.gmra.mrb[0].mxu0 %v156_v19 }
  0x4c   :  { %1601 = vmatpush3.bf16.msra.mxu1 %v1600_v28  ;;  %1607 = vmatpush3.bf16.msra.mxu0 %v1606_v34  ;;  %v798_v40 = vand.u32 4294901760, %v797_v27 }
  0x4d   :  { %1602 = vmatprep.subr.bf16.mxu1 %v1789_v0  ;;  %1608 = vmatprep.subr.bf16.mxu0 %v1789_v0 }
  0x4e   :  { %1419 = vmatprep.mubr.msk.f32.mxu0 %vm1790_vm0, %v1791_v1 }
  0x50   :  { %1604 = vmatpush3.bf16.msra.mxu1 %v1603_v44  ;;  %1610 = vmatpush3.bf16.msra.mxu0 %v1609_v46 }
  0x51   :  { %1611 = vmatprep.subr.bf16.mxu0 %v1789_v0  ;;  %1629 = vmatprep.subr.bf16.mxu1 %v1789_v0 }
  0x53   :  { %1385 = vmatmul.mubr.f32.vlgmr.msra.gmra.mrb[0].mxu1 %v1957_v47 }
  0x54   :  { %1613 = vmatpush3.bf16.msra.mxu0 %v1612_v51  ;;  %1631 = vmatpush3.bf16.msra.mxu1 %v1860_v15 }
  0x55   :  { %1614 = vmatprep.subr.bf16.mxu0 %v1789_v0  ;;  %1632 = vmatprep.subr.bf16.mxu1 %v1789_v0 }
  0x56   :  { %1454 = vmatprep.mubr.msk.f32.mxu1 %vm1790_vm0, %v1791_v1 }
  0x58   :  { %1616 = vmatpush3.bf16.msra.mxu0 %v1615_v60  ;;  %1634 = vmatpush3.bf16.msra.mxu1 %v1868_v21 }
  0x59   :  { %1617 = vmatprep.subr.bf16.mxu0 %v1789_v0  ;;  %1635 = vmatprep.subr.bf16.mxu1 %v1789_v0 }
  0x5c   :  { %1619 = vmatpush3.bf16.msra.mxu0 %v1618_v62  ;;  %1637 = vmatpush3.bf16.msra.mxu1 %v1899_v42 }
  0x5d   :  { %1620 = vmatprep.subr.bf16.mxu0 %v1789_v0  ;;  %1638 = vmatprep.subr.bf16.mxu1 %v1789_v0 }
  0x60   :  { %1622 = vmatpush3.bf16.msra.mxu0 %v1621_v5  ;;  %1640 = vmatpush3.bf16.msra.mxu1 %v1901_v45 }
  0x61   :  { %1623 = vmatprep.subr.bf16.mxu0 %v1789_v0  ;;  %1641 = vmatprep.subr.bf16.mxu1 %v1789_v0 }
  0x64   :  { %1625 = vmatpush3.bf16.msra.mxu0 %v1624_v6  ;;  %1643 = vmatpush3.bf16.msra.mxu1 %v1916_v61 }
  0x65   :  { %1626 = vmatprep.subr.bf16.mxu0 %v1789_v0  ;;  %1644 = vmatprep.subr.bf16.mxu1 %v1789_v0 }
  0x68   :  { %1628 = vmatpush3.bf16.msra.mxu0 %v1627_v7  ;;  %1646 = vmatpush3.bf16.msra.mxu1 %v1949_v38 }
  0x69   :  { %1647 = vmatprep.subr.bf16.mxu1 %v1789_v0  ;;  %1653 = vmatprep.subr.bf16.mxu0 %v1789_v0 }
  0x6b   :  { %1420 = vmatmul.mubr.f32.vlgmr.msra.gmra.mrb[2].mxu0 %v1970_v56 }
  0x6c   :  { %1649 = vmatpush3.bf16.msra.mxu1 %v1972_v59  ;;  %1655 = vmatpush3.bf16.msra.mxu0 %v1654_v10 }
  0x6d   :  { %1650 = vmatprep.subr.bf16.mxu1 %v1789_v0  ;;  %1656 = vmatprep.subr.bf16.mxu0 %v1789_v0 }
  0x6e   :  { %1489 = vmatprep.mubr.msk.f32.mxu0 %vm1790_vm0, %v1791_v1 }
  0x70   :  { %1652 = vmatpush3.bf16.msra.mxu1 %v1986_v8  ;;  %1658 = vmatpush3.bf16.msra.mxu0 %v1657_v12 }
  0x71   :  { %1659 = vmatprep.subr.bf16.mxu0 %v1789_v0  ;;  %1677 = vmatprep.subr.bf16.mxu1 %v1789_v0 }
  0x73   :  { %1455 = vmatmul.mubr.f32.vlgmr.msra.gmra.mrb[2].mxu1 %v154_v2 }
  0x74   :  { %1661 = vmatpush3.bf16.msra.mxu0 %v1660_v16  ;;  %1679 = vmatpush3.bf16.msra.mxu1 %v1860_v15  ;;  %v1666_v15 = vpack.c.bf16 %v228_v14, %v221_v11 }
  0x75   :  { %1662 = vmatprep.subr.bf16.mxu0 %v1789_v0  ;;  %1680 = vmatprep.subr.bf16.mxu1 %v1789_v0 }
  0x76   :  { %1524 = vmatprep.mubr.msk.f32.mxu1 %vm1790_vm0, %v1791_v1 }
  0x78   :  { %1664 = vmatpush3.bf16.msra.mxu0 %v1663_v17  ;;  %1682 = vmatpush3.bf16.msra.mxu1 %v1868_v21  ;;  %v1672_v21 = vpack.c.bf16 %v256_v54, %v249_v53 }
  0x79   :  { %1665 = vmatprep.subr.bf16.mxu0 %v1789_v0  ;;  %1683 = vmatprep.subr.bf16.mxu1 %v1789_v0 }
  0x7c   :  { %1667 = vmatpush3.bf16.msra.mxu0 %v1666_v15  ;;  %1685 = vmatpush3.bf16.msra.mxu1 %v1899_v42 }
  0x7d   :  { %1668 = vmatprep.subr.bf16.mxu0 %v1789_v0  ;;  %1686 = vmatprep.subr.bf16.mxu1 %v1789_v0 }
  0x80   :  { %1670 = vmatpush3.bf16.msra.mxu0 %v1669_v18  ;;  %1688 = vmatpush3.bf16.msra.mxu1 %v1901_v45 }
  0x81   :  { %1671 = vmatprep.subr.bf16.mxu0 %v1789_v0  ;;  %1689 = vmatprep.subr.bf16.mxu1 %v1789_v0 }
  0x84   :  { %1673 = vmatpush3.bf16.msra.mxu0 %v1672_v21  ;;  %1691 = vmatpush3.bf16.msra.mxu1 %v1916_v61 }
  0x85   :  { %1674 = vmatprep.subr.bf16.mxu0 %v1789_v0  ;;  %1692 = vmatprep.subr.bf16.mxu1 %v1789_v0 }
  0x88   :  { %1676 = vmatpush3.bf16.msra.mxu0 %v1675_v22  ;;  %1694 = vmatpush3.bf16.msra.mxu1 %v1949_v38 }
  0x89   :  { %1695 = vmatprep.subr.bf16.mxu1 %v1789_v0  ;;  %1527 = vmatprep.subr.mxu0 %v1791_v1 }
  0x8b   :  { %1490 = vmatmul.mubr.f32.vlgmr.msra.gmra.mrb[4].mxu0 %v1957_v47 }
  0x8c   :  { %1697 = vmatpush3.bf16.msra.mxu1 %v1972_v59  ;;  %1529 = vmatprep.mubr.msk.f32.mxu0 %vm1790_vm0, %v1791_v1 }
  0x8d   :  { %1698 = vmatprep.subr.bf16.mxu1 %v1789_v0 }
  0x90   :  { %1700 = vmatpush3.bf16.msra.mxu1 %v1986_v8 }
  0x91   :  { %1532 = vmatprep.subr.mxu1 %v1791_v1 }
  0x93   :  { %1525 = vmatmul.mubr.f32.vlgmr.msra.gmra.mrb[4].mxu1 %v1957_v47 }
  0x94   :  { %1534 = vmatprep.mubr.msk.f32.mxu1 %vm1790_vm0, %v1791_v1 }
 0x11e   :  { %v158_v23 = vpop.f32.mrb[0].mxu0 }
 0x11f   :  { %v1351_v24 = vpop.f32.mrb[1].mxu0 }
 0x126   :  { %v309_v25 = vpop.f32.mrb[0].mxu1 }
 0x127   :  { %v310_v29 = vadd.f32 %v309_v25, %v158_v23  ;;  %v1386_v30 = vpop.f32.mrb[1].mxu1 }
 0x13e   :  { %v413_v32 = vpop.f32.mrb[2].mxu0 }
 0x13f   :  { %v414_v35 = vadd.f32 %v413_v32, %v310_v29  ;;  %v1421_v36 = vpop.f32.mrb[3].mxu0 }
 0x146   :  { %v502_v42 = vpop.f32.mrb[2].mxu1 }
 0x147   :  { %v503_v45 = vadd.f32 %v502_v42, %v414_v35  ;;  %v1456_v0 = vpop.f32.mrb[3].mxu1 }
 0x15e   :  { %v621_v49 = vpop.f32.mrb[4].mxu0 }
 0x15f   :  { %v622_v55 = vadd.f32 %v621_v49, %v503_v45  ;;  %v1491_v57 = vpop.f32.mrb[5].mxu0 }
 0x166   :  { %v708_v61 = vpop.f32.mrb[4].mxu1 }
 0x167   :  { %v709_v11 = vadd.f32 %v708_v61, %v622_v55  ;;  %v1526_v14 = vpop.f32.mrb[5].mxu1 }
 0x169   :  { %v725_v26 = vadd.f32 %v1201_v4, %v709_v11 }
 0x16b   :  { %v726_v37 = vmax.f32 %v725_v26, 0.0 }
 0x16d   :  { %v729_v38 = vand.u32 4294901760, %v726_v37 }
 0x16f   :  { %v806_v41 = vsub.f32 %v726_v37, %v729_v38  ;;  %1528 = vmatpush3.xpose.msra.mxu0 %v729_v38 }
 0x170   :  { %1537 = vmatprep.subr.mxu0 %v1791_v1 }
 0x171   :  { %v807_v47 = vand.u32 4294901760, %v806_v41 }
 0x172   :  { %1530 = vmatmul.mubr.f32.vlgmr.msra.gmra.mrb[6].mxu0 %v798_v40 }
 0x173   :  { %1538 = vmatpush3.xpose.msra.mxu0 %v806_v41  ;;  %1539 = vmatprep.mubr.msk.f32.mxu0 %vm1790_vm0, %v1791_v1  ;;  %v808_v50 = vsub.f32 %v806_v41, %v807_v47 }
 0x174   :  { %1547 = vmatprep.subr.mxu0 %v1791_v1 }
 0x175   :  { %v809_v53 = vand.u32 4294901760, %v808_v50 }
 0x176   :  { %1540 = vmatmul.mubr.f32.vlgmr.msra.gmra.mrb[8].mxu0 %v795_v58 }
 0x177   :  { %1533 = vmatpush3.xpose.msra.mxu1 %v809_v53  ;;  %1548 = vmatpush3.xpose.msra.mxu0 %v807_v47 }
 0x178   :  { %1542 = vmatprep.subr.mxu1 %v1791_v1  ;;  %1549 = vmatprep.mubr.msk.f32.mxu0 %vm1790_vm0, %v1791_v1 }
 0x17a   :  { %1535 = vmatmul.mubr.f32.vlgmr.msra.gmra.mrb[6].mxu1 %v794_v52  ;;  %1550 = vmatmul.mubr.f32.vlgmr.msra.gmra.mrb[10].mxu0 %v794_v52 }
 0x17b   :  { %1543 = vmatpush3.xpose.msra.mxu1 %v729_v38  ;;  %1544 = vmatprep.mubr.msk.f32.mxu1 %vm1790_vm0, %v1791_v1 }
 0x17c   :  { %1552 = vmatprep.subr.mxu1 %v1791_v1 }
 0x17e   :  { %1545 = vmatmul.mubr.f32.vlgmr.msra.gmra.mrb[8].mxu1 %v796_v9 }
 0x17f   :  { %1553 = vmatpush3.xpose.msra.mxu1 %v729_v38  ;;  %1554 = vmatprep.mubr.msk.f32.mxu1 %vm1790_vm0, %v1791_v1  ;;  %v1175_v1 = vstv %s2156_s4 }
 0x182   :  { %1555 = vmatmul.mubr.f32.vlgmr.msra.gmra.mrb[10].mxu1 %v794_v52 }
 0x245   :  { %v800_v54 = vpop.f32.mrb[6].mxu0 }
 0x246   :  { %v1531_v56 = vpop.f32.mrb[7].mxu0 }
 0x249   :  { %v950_v59 = vpop.f32.mrb[8].mxu0 }
 0x24a   :  { %v1541_v2 = vpop.f32.mrb[9].mxu0 }
 0x24d   :  { %v876_v3 = vpop.f32.mrb[6].mxu1  ;;  %v1098_v63 = vpop.f32.mrb[10].mxu0 }
 0x24e   :  { %v877_v8 = vadd.f32 %v876_v3, %v800_v54  ;;  %v1536_v13 = vpop.f32.mrb[7].mxu1  ;;  %v1551_v20 = vpop.f32.mrb[11].mxu0 }
 0x250   :  { %v951_v31 = vadd.f32 %v950_v59, %v877_v8 }
 0x251   :  { %v1024_v33 = vpop.f32.mrb[8].mxu1 }
 0x252   :  { %v1025_v19 = vadd.f32 %v1024_v33, %v951_v31  ;;  %v1546_v28 = vpop.f32.mrb[9].mxu1 }
 0x254   :  { %v1099_v34 = vadd.f32 %v1098_v63, %v1025_v19 }
 0x255   :  { %v1170_v39 = vpop.f32.mrb[10].mxu1 }
 0x256   :  { %v1171_v43 = vadd.f32 %v1170_v39, %v1099_v34  ;;  %v1556_v44 = vpop.f32.mrb[11].mxu1 }
 0x258   :  { %v1176_v46 = vadd.f32 %v1175_v1, %v1171_v43 }
 0x25a   :  { %v1202_v51 = vmul.f32 -1.442695, %v1176_v46 }
 0x25c   :  { %1709 = vpow2.f32 %v1202_v51 }
 0x266   :  { %v1710_v60 = vpop.eup %1709 }
 0x267   :  { %v1180_v62 = vadd.f32 1.0, %v1710_v60 }
 0x269   :  { %1711 = vrcp.f32 %v1180_v62 }
 0x273   :  { %v1712_v5 = vpop.eup %1711 }
 0x274   :  { %1184 = vst.msk [vmem:[#allocation9] sm:$0x1] %vm1183_vm1, %v1712_v5 }
 0x275   :  { %1768 = shalt.err (!%p1765_p6)
}
 0x276   :  { %s1769_s26 = scalar_lea.hbm %s2157_s5, 16 }
 0x277   :  { %p1770_p7 = scmp.ne.s32.totalorder %s2157_s5, %s1769_s26  ;;  %p1773_p8 = scmp.lt.u32.totalorder %s1769_s26, %s2157_s5 }
 0x279   :  { %p1775_p9 = pnand %p1773_p8, %p1770_p7 }
 0x27b   :  { %1778 = shalt.err (!%p1775_p9)
}
 0x27c   :  { %1194 = dma.vmem_to_hbm [thread:$0]  %s1192_s22, 16, %s2157_s5, [#allocation6]  }
 0x27d   :  { %1783 = dma.done.wait [#allocation6], 16  }
 0x27e   :  { %1784 = vsyncadd [#allocation6], 4294967280 }
 0x27f   :  { %1198 = vsyncpa [#allocation5], 1 }
 0x280   :  { %1199 = vsyncpa [#allocation8], 1 }
 0x281   :  { %1200 = vsyncpa [#allocation6], 1 }

</bundles_post_ra>
